<compile_context>
chip_gen: v7x
topology: tpu7x:2x2x1
jax: 0.10.0
libtpu: 0.0.40
codegen_flags: <defaults>
</compile_context>

<pallas_src>
import functools

import jax
import jax.numpy as jnp
from jax import lax
from jax.experimental import pallas as pl
from jax.experimental.pallas import tpu as pltpu


# ---------------------------------------------------------------------------
# Fused kernel: QKV projection + per-head SDP attention + output projection
# ---------------------------------------------------------------------------

def _fused_mha_kernel(x_ref, wqkv_ref, bqkv_ref, wo_ref, bo_ref, mask_ref,
                      out_ref, attn_ref, *, n_heads, d_k, d_v):
    """One batch element per grid step.

    x_ref    : [1, L, d_model]
    wqkv_ref : [d_model, 2*H*d_k + H*d_v]   (W_Q | W_K | W_V concatenated)
    bqkv_ref : [1, 2*H*d_k + H*d_v]
    wo_ref   : [H*d_v, d_model]
    bo_ref   : [1, d_model]
    mask_ref : [L, L]   (mask_global pre-multiplied by the softmax scale)
    out_ref  : [1, L, d_model]
    attn_ref : [1, H, L, L]
    """
    x = x_ref[0]                                            # (L, d_model)

    # Single fused QKV projection on the MXU, f32 accumulation.
    qkv = (jnp.dot(x, wqkv_ref[...], preferred_element_type=jnp.float32)
           + bqkv_ref[...])                                 # (L, 2*H*d_k + H*d_v)

    Hdk = n_heads * d_k
    q = qkv[:, :Hdk]                                        # (L, H*d_k)
    k = qkv[:, Hdk:2 * Hdk]                                 # (L, H*d_k)
    v = qkv[:, 2 * Hdk:]                                    # (L, H*d_v)
    m = mask_ref[...]                                       # (L, L), scale folded in

    ctx_heads = []
    for h in range(n_heads):                                # static unroll over heads
        qh = q[:, h * d_k:(h + 1) * d_k]                    # (L, d_k)
        kh = k[:, h * d_k:(h + 1) * d_k]                    # (L, d_k)
        vh = v[:, h * d_v:(h + 1) * d_v]                    # (L, d_v)

        # scores = qh @ kh^T without materializing a transposed K
        scores = lax.dot_general(
            qh, kh, (((1,), (1,)), ((), ())),
            preferred_element_type=jnp.float32)             # (L, L)
        scores = scores * m                                 # mul(scores, mask) * scale

        # numerically-stable softmax over the key axis (f32 on the VPU)
        mx = jnp.max(scores, axis=-1, keepdims=True)
        e = jnp.exp(scores - mx)
        denom = jnp.sum(e, axis=-1, keepdims=True)
        # approx=False keeps full f32 accuracy; flip to True for EUP vrcp when
        # the (L,L) tile becomes the VALU hot spot at large L.
        attn = e * pl.reciprocal(denom, approx=False)       # (L, L)

        attn_ref[0, h] = attn.astype(attn_ref.dtype)
        ctx_heads.append(
            jnp.dot(attn, vh, preferred_element_type=jnp.float32))  # (L, d_v)

    # Lane-dense context slab [L, H*d_v] (matches transpose(1,2).view(bs,-1,H*d_v))
    ctx = jnp.concatenate(ctx_heads, axis=-1)               # (L, H*d_v)

    out = (jnp.dot(ctx, wo_ref[...], preferred_element_type=jnp.float32)
           + bo_ref[...])                                   # (L, d_model)
    out_ref[0] = out.astype(out_ref.dtype)


def multihead_attention_pallas(params, Q, mask_global, n_heads, d_k, d_v):
    """Forward of _MultiheadAttention (self-attention, res_attention=False path).

    Q: [bs, L, d_model]; K = V = Q (default call path of the PyTorch module).
    Returns (output [bs, L, d_model], attn_weights [bs, n_heads, L, L]).
    """
    bs, L, d_model = Q.shape
    head_dim = d_model // n_heads
    scale = float(head_dim) ** -0.5   # nn.Parameter(head_dim**-0.5), lsa=False

    # Fuse the three projection weights into one MXU operand.
    W_qkv = jnp.concatenate([params["W_Q"], params["W_K"], params["W_V"]], axis=1)
    b_qkv = jnp.concatenate([params["b_Q"], params["b_K"], params["b_V"]])[None, :]
    W_O = params["W_O"]
    b_O = params["b_O"][None, :]

    # Fold the softmax scale into the multiplicative global mask (commutative).
    mask_scaled = (mask_global * scale).astype(jnp.float32)

    N3 = W_qkv.shape[1]           # 2*H*d_k + H*d_v
    Hdv = n_heads * d_v

    kernel = functools.partial(_fused_mha_kernel,
                               n_heads=n_heads, d_k=d_k, d_v=d_v)

    out, attn = pl.pallas_call(
        kernel,
        out_shape=(
            jax.ShapeDtypeStruct((bs, L, d_model), Q.dtype),
            jax.ShapeDtypeStruct((bs, n_heads, L, L), jnp.float32),
        ),
        grid_spec=pltpu.PrefetchScalarGridSpec(
            num_scalar_prefetch=0,
            grid=(bs,),
            in_specs=[
                pl.BlockSpec((1, L, d_model), lambda b: (b, 0, 0)),   # x (per batch)
                pl.BlockSpec((d_model, N3), lambda b: (0, 0)),        # W_qkv (resident)
                pl.BlockSpec((1, N3), lambda b: (0, 0)),              # b_qkv
                pl.BlockSpec((Hdv, d_model), lambda b: (0, 0)),       # W_O (resident)
                pl.BlockSpec((1, d_model), lambda b: (0, 0)),         # b_O
                pl.BlockSpec((L, L), lambda b: (0, 0)),               # scaled mask
            ],
            out_specs=[
                pl.BlockSpec((1, L, d_model), lambda b: (b, 0, 0)),
                pl.BlockSpec((1, n_heads, L, L), lambda b: (b, 0, 0, 0)),
            ],
        ),
        compiler_params=pltpu.CompilerParams(
            dimension_semantics=("parallel",)),   # shards over 2 TCs on v7x
    )(Q, W_qkv, b_qkv, W_O, b_O, mask_scaled)

    return out, attn


# ---------------------------------------------------------------------------
# Parameter init + pure-JAX reference (for correctness check)
# ---------------------------------------------------------------------------

def init_params(key, d_model, n_heads, d_k=None, d_v=None, dtype=jnp.float32):
    d_k = d_model // n_heads if d_k is None else d_k
    d_v = d_model // n_heads if d_v is None else d_v
    ks = jax.random.split(key, 8)
    s = 0.05
    params = {
        "W_Q": s * jax.random.normal(ks[0], (d_model, n_heads * d_k), dtype),
        "b_Q": s * jax.random.normal(ks[1], (n_heads * d_k,), dtype),
        "W_K": s * jax.random.normal(ks[2], (d_model, n_heads * d_k), dtype),
        "b_K": s * jax.random.normal(ks[3], (n_heads * d_k,), dtype),
        "W_V": s * jax.random.normal(ks[4], (d_model, n_heads * d_v), dtype),
        "b_V": s * jax.random.normal(ks[5], (n_heads * d_v,), dtype),
        "W_O": s * jax.random.normal(ks[6], (n_heads * d_v, d_model), dtype),
        "b_O": s * jax.random.normal(ks[7], (d_model,), dtype),
    }
    return params, d_k, d_v


def multihead_attention_ref(params, Q, mask_global, n_heads, d_k, d_v):
    bs, L, d_model = Q.shape
    head_dim = d_model // n_heads
    scale = float(head_dim) ** -0.5

    q_p = Q @ params["W_Q"] + params["b_Q"]
    k_p = Q @ params["W_K"] + params["b_K"]
    v_p = Q @ params["W_V"] + params["b_V"]

    q_s = q_p.reshape(bs, L, n_heads, d_k).transpose(0, 2, 1, 3)
    k_s = k_p.reshape(bs, L, n_heads, d_k).transpose(0, 2, 3, 1)
    v_s = v_p.reshape(bs, L, n_heads, d_v).transpose(0, 2, 1, 3)

    scores = jnp.einsum("bhqd,bhdk->bhqk", q_s, k_s) * mask_global * scale
    attn = jax.nn.softmax(scores, axis=-1)
    out = jnp.einsum("bhqk,bhkd->bhqd", attn, v_s)
    out = out.transpose(0, 2, 1, 3).reshape(bs, L, n_heads * d_v)
    out = out @ params["W_O"] + params["b_O"]
    return out, attn


# ---------------------------------------------------------------------------
# Main
# ---------------------------------------------------------------------------

if __name__ == "__main__":
    # Small shapes: bs=2, seq_len=8, d_model=32, n_heads=4 -> d_k=d_v=8
    bs, L, d_model, n_heads = 2, 8, 32, 4

    key = jax.random.PRNGKey(0)
    k_param, k_q, k_mask = jax.random.split(key, 3)

    params, d_k, d_v = init_params(k_param, d_model, n_heads)

    Q = jax.random.normal(k_q, (bs, L, d_model), jnp.float32)
    # mask_global multiplies attention scores element-wise (broadcast over bs, heads)
    mask_global = jax.random.uniform(k_mask, (L, L), jnp.float32, 0.5, 1.5)

    out, attn = multihead_attention_pallas(params, Q, mask_global, n_heads, d_k, d_v)
    out = jax.block_until_ready(out)
    attn = jax.block_until_ready(attn)

    out_ref, attn_ref = multihead_attention_ref(params, Q, mask_global, n_heads, d_k, d_v)

    assert out.shape == (bs, L, d_model)
    assert attn.shape == (bs, n_heads, L, L)
    assert jnp.allclose(out, out_ref, atol=1e-4, rtol=1e-4)
    assert jnp.allclose(attn, attn_ref, atol=1e-4, rtol=1e-4)

    print("KERNEL_OK")
</pallas_src>

<mosaic_0001>
module attributes {stable_mosaic.version = 11 : i64} {
  func.func @_fused_mha_kernel(%arg0: i32, %arg1: memref<1x8x32xf32, #tpu.memory_space<vmem>>, %arg2: memref<32x96xf32, #tpu.memory_space<vmem>>, %arg3: memref<1x96xf32, #tpu.memory_space<vmem>>, %arg4: memref<32x32xf32, #tpu.memory_space<vmem>>, %arg5: memref<1x32xf32, #tpu.memory_space<vmem>>, %arg6: memref<8x8xf32, #tpu.memory_space<vmem>>, %arg7: memref<1x8x32xf32, #tpu.memory_space<vmem>>, %arg8: memref<1x4x8x8xf32, #tpu.memory_space<vmem>>) attributes {dimension_semantics = [#tpu.dimension_semantics<parallel>], iteration_bounds = array<i64: 2>, scalar_prefetch = 0 : i64, scratch_operands = 0 : i64, tpu.core_type = #tpu.core_type<tc>, window_params = [{transform_indices = @transform_0, window_bounds = array<i64: 1, 8, 32>}, {pipeline_mode = #tpu.pipeline_mode<synchronous>, transform_indices = @transform_1, window_bounds = array<i64: 32, 96>}, {pipeline_mode = #tpu.pipeline_mode<synchronous>, transform_indices = @transform_2, window_bounds = array<i64: 1, 96>}, {pipeline_mode = #tpu.pipeline_mode<synchronous>, transform_indices = @transform_3, window_bounds = array<i64: 32, 32>}, {pipeline_mode = #tpu.pipeline_mode<synchronous>, transform_indices = @transform_4, window_bounds = array<i64: 1, 32>}, {pipeline_mode = #tpu.pipeline_mode<synchronous>, transform_indices = @transform_5, window_bounds = array<i64: 8, 8>}, {transform_indices = @transform_6, window_bounds = array<i64: 1, 8, 32>}, {transform_indices = @transform_7, window_bounds = array<i64: 1, 4, 8, 8>}]} {
    %c0 = arith.constant 0 : index
    %c0_0 = arith.constant 0 : index
    %c0_1 = arith.constant 0 : index
    %0 = vector.load %arg1[%c0, %c0_0, %c0_1] : memref<1x8x32xf32, #tpu.memory_space<vmem>>, vector<1x8x32xf32>
    %1 = vector.shape_cast %0 : vector<1x8x32xf32> to vector<8x32xf32>
    %c0_2 = arith.constant 0 : index
    %c0_3 = arith.constant 0 : index
    %2 = vector.load %arg2[%c0_2, %c0_3] : memref<32x96xf32, #tpu.memory_space<vmem>>, vector<32x96xf32>
    %cst = arith.constant dense<0.000000e+00> : vector<8x96xf32>
    %3 = tpu.matmul %1, %2, %cst {dimension_numbers = #tpu.dot_dimension_numbers<[1], [0], [0], [1], [0, 0, 1, 1], [], []>} : vector<8x32xf32>, vector<32x96xf32>, vector<8x96xf32> -> vector<8x96xf32>
    %c0_4 = arith.constant 0 : index
    %c0_5 = arith.constant 0 : index
    %4 = vector.load %arg3[%c0_4, %c0_5] : memref<1x96xf32, #tpu.memory_space<vmem>>, vector<1x96xf32>
    %5 = vector.broadcast %4 : vector<1x96xf32> to vector<8x96xf32>
    %6 = arith.addf %3, %5 : vector<8x96xf32>
    %7 = vector.extract_strided_slice %6 {offsets = [0, 0], sizes = [8, 32], strides = [1, 1]} : vector<8x96xf32> to vector<8x32xf32>
    %8 = vector.extract_strided_slice %6 {offsets = [0, 32], sizes = [8, 32], strides = [1, 1]} : vector<8x96xf32> to vector<8x32xf32>
    %9 = vector.extract_strided_slice %6 {offsets = [0, 64], sizes = [8, 32], strides = [1, 1]} : vector<8x96xf32> to vector<8x32xf32>
    %c0_6 = arith.constant 0 : index
    %c0_7 = arith.constant 0 : index
    %10 = vector.load %arg6[%c0_6, %c0_7] : memref<8x8xf32, #tpu.memory_space<vmem>>, vector<8x8xf32>
    %11 = vector.extract_strided_slice %7 {offsets = [0, 0], sizes = [8, 8], strides = [1, 1]} : vector<8x32xf32> to vector<8x8xf32>
    %12 = vector.extract_strided_slice %8 {offsets = [0, 0], sizes = [8, 8], strides = [1, 1]} : vector<8x32xf32> to vector<8x8xf32>
    %13 = vector.extract_strided_slice %9 {offsets = [0, 0], sizes = [8, 8], strides = [1, 1]} : vector<8x32xf32> to vector<8x8xf32>
    %cst_8 = arith.constant dense<0.000000e+00> : vector<8x8xf32>
    %14 = tpu.matmul %11, %12, %cst_8 {dimension_numbers = #tpu.dot_dimension_numbers<[1], [1], [0], [0], [0, 0, 1, 0], [], []>} : vector<8x8xf32>, vector<8x8xf32>, vector<8x8xf32> -> vector<8x8xf32>
    %15 = arith.mulf %14, %10 : vector<8x8xf32>
    %cst_9 = arith.constant dense<0xFF800000> : vector<8xf32>
    %16 = vector.multi_reduction <maximumf>, %15, %cst_9 [1] : vector<8x8xf32> to vector<8xf32>
    %17 = vector.shape_cast %16 : vector<8xf32> to vector<8x1xf32>
    %18 = vector.broadcast %17 : vector<8x1xf32> to vector<8x8xf32>
    %19 = arith.subf %15, %18 : vector<8x8xf32>
    %20 = math.exp %19 : vector<8x8xf32>
    %cst_10 = arith.constant dense<0.000000e+00> : vector<8xf32>
    %21 = vector.multi_reduction <add>, %20, %cst_10 [1] : vector<8x8xf32> to vector<8xf32>
    %22 = vector.shape_cast %21 : vector<8xf32> to vector<8x1xf32>
    %23 = tpu.reciprocal %22 : vector<8x1xf32> -> vector<8x1xf32>
    %24 = vector.broadcast %23 : vector<8x1xf32> to vector<8x8xf32>
    %25 = arith.mulf %20, %24 : vector<8x8xf32>
    %c0_11 = arith.constant 0 : index
    %c0_12 = arith.constant 0 : index
    %c0_13 = arith.constant 0 : index
    %c0_14 = arith.constant 0 : index
    %26 = vector.load %arg8[%c0_11, %c0_12, %c0_13, %c0_14] : memref<1x4x8x8xf32, #tpu.memory_space<vmem>>, vector<1x1x8x8xf32>
    %27 = vector.shape_cast %26 : vector<1x1x8x8xf32> to vector<8x8xf32>
    %28 = vector.shape_cast %25 : vector<8x8xf32> to vector<1x1x8x8xf32>
    tpu.vector_store %arg8[%c0_11, %c0_12, %c0_13, %c0_14], %28 {strides = array<i32>} : memref<1x4x8x8xf32, #tpu.memory_space<vmem>>, vector<1x1x8x8xf32>,
    %cst_15 = arith.constant dense<0.000000e+00> : vector<8x8xf32>
    %29 = tpu.matmul %25, %13, %cst_15 {dimension_numbers = #tpu.dot_dimension_numbers<[1], [0], [0], [1], [0, 0, 1, 1], [], []>} : vector<8x8xf32>, vector<8x8xf32>, vector<8x8xf32> -> vector<8x8xf32>
    %30 = vector.extract_strided_slice %7 {offsets = [0, 8], sizes = [8, 8], strides = [1, 1]} : vector<8x32xf32> to vector<8x8xf32>
    %31 = vector.extract_strided_slice %8 {offsets = [0, 8], sizes = [8, 8], strides = [1, 1]} : vector<8x32xf32> to vector<8x8xf32>
    %32 = vector.extract_strided_slice %9 {offsets = [0, 8], sizes = [8, 8], strides = [1, 1]} : vector<8x32xf32> to vector<8x8xf32>
    %cst_16 = arith.constant dense<0.000000e+00> : vector<8x8xf32>
    %33 = tpu.matmul %30, %31, %cst_16 {dimension_numbers = #tpu.dot_dimension_numbers<[1], [1], [0], [0], [0, 0, 1, 0], [], []>} : vector<8x8xf32>, vector<8x8xf32>, vector<8x8xf32> -> vector<8x8xf32>
    %34 = arith.mulf %33, %10 : vector<8x8xf32>
    %cst_17 = arith.constant dense<0xFF800000> : vector<8xf32>
    %35 = vector.multi_reduction <maximumf>, %34, %cst_17 [1] : vector<8x8xf32> to vector<8xf32>
    %36 = vector.shape_cast %35 : vector<8xf32> to vector<8x1xf32>
    %37 = vector.broadcast %36 : vector<8x1xf32> to vector<8x8xf32>
    %38 = arith.subf %34, %37 : vector<8x8xf32>
    %39 = math.exp %38 : vector<8x8xf32>
    %cst_18 = arith.constant dense<0.000000e+00> : vector<8xf32>
    %40 = vector.multi_reduction <add>, %39, %cst_18 [1] : vector<8x8xf32> to vector<8xf32>
    %41 = vector.shape_cast %40 : vector<8xf32> to vector<8x1xf32>
    %42 = tpu.reciprocal %41 : vector<8x1xf32> -> vector<8x1xf32>
    %43 = vector.broadcast %42 : vector<8x1xf32> to vector<8x8xf32>
    %44 = arith.mulf %39, %43 : vector<8x8xf32>
    %c0_19 = arith.constant 0 : index
    %c1 = arith.constant 1 : index
    %c0_20 = arith.constant 0 : index
    %c0_21 = arith.constant 0 : index
    %45 = vector.load %arg8[%c0_19, %c1, %c0_20, %c0_21] : memref<1x4x8x8xf32, #tpu.memory_space<vmem>>, vector<1x1x8x8xf32>
    %46 = vector.shape_cast %45 : vector<1x1x8x8xf32> to vector<8x8xf32>
    %47 = vector.shape_cast %44 : vector<8x8xf32> to vector<1x1x8x8xf32>
    tpu.vector_store %arg8[%c0_19, %c1, %c0_20, %c0_21], %47 {strides = array<i32>} : memref<1x4x8x8xf32, #tpu.memory_space<vmem>>, vector<1x1x8x8xf32>,
    %cst_22 = arith.constant dense<0.000000e+00> : vector<8x8xf32>
    %48 = tpu.matmul %44, %32, %cst_22 {dimension_numbers = #tpu.dot_dimension_numbers<[1], [0], [0], [1], [0, 0, 1, 1], [], []>} : vector<8x8xf32>, vector<8x8xf32>, vector<8x8xf32> -> vector<8x8xf32>
    %49 = vector.extract_strided_slice %7 {offsets = [0, 16], sizes = [8, 8], strides = [1, 1]} : vector<8x32xf32> to vector<8x8xf32>
    %50 = vector.extract_strided_slice %8 {offsets = [0, 16], sizes = [8, 8], strides = [1, 1]} : vector<8x32xf32> to vector<8x8xf32>
    %51 = vector.extract_strided_slice %9 {offsets = [0, 16], sizes = [8, 8], strides = [1, 1]} : vector<8x32xf32> to vector<8x8xf32>
    %cst_23 = arith.constant dense<0.000000e+00> : vector<8x8xf32>
    %52 = tpu.matmul %49, %50, %cst_23 {dimension_numbers = #tpu.dot_dimension_numbers<[1], [1], [0], [0], [0, 0, 1, 0], [], []>} : vector<8x8xf32>, vector<8x8xf32>, vector<8x8xf32> -> vector<8x8xf32>
    %53 = arith.mulf %52, %10 : vector<8x8xf32>
    %cst_24 = arith.constant dense<0xFF800000> : vector<8xf32>
    %54 = vector.multi_reduction <maximumf>, %53, %cst_24 [1] : vector<8x8xf32> to vector<8xf32>
    %55 = vector.shape_cast %54 : vector<8xf32> to vector<8x1xf32>
    %56 = vector.broadcast %55 : vector<8x1xf32> to vector<8x8xf32>
    %57 = arith.subf %53, %56 : vector<8x8xf32>
    %58 = math.exp %57 : vector<8x8xf32>
    %cst_25 = arith.constant dense<0.000000e+00> : vector<8xf32>
    %59 = vector.multi_reduction <add>, %58, %cst_25 [1] : vector<8x8xf32> to vector<8xf32>
    %60 = vector.shape_cast %59 : vector<8xf32> to vector<8x1xf32>
    %61 = tpu.reciprocal %60 : vector<8x1xf32> -> vector<8x1xf32>
    %62 = vector.broadcast %61 : vector<8x1xf32> to vector<8x8xf32>
    %63 = arith.mulf %58, %62 : vector<8x8xf32>
    %c0_26 = arith.constant 0 : index
    %c2 = arith.constant 2 : index
    %c0_27 = arith.constant 0 : index
    %c0_28 = arith.constant 0 : index
    %64 = vector.load %arg8[%c0_26, %c2, %c0_27, %c0_28] : memref<1x4x8x8xf32, #tpu.memory_space<vmem>>, vector<1x1x8x8xf32>
    %65 = vector.shape_cast %64 : vector<1x1x8x8xf32> to vector<8x8xf32>
    %66 = vector.shape_cast %63 : vector<8x8xf32> to vector<1x1x8x8xf32>
    tpu.vector_store %arg8[%c0_26, %c2, %c0_27, %c0_28], %66 {strides = array<i32>} : memref<1x4x8x8xf32, #tpu.memory_space<vmem>>, vector<1x1x8x8xf32>,
    %cst_29 = arith.constant dense<0.000000e+00> : vector<8x8xf32>
    %67 = tpu.matmul %63, %51, %cst_29 {dimension_numbers = #tpu.dot_dimension_numbers<[1], [0], [0], [1], [0, 0, 1, 1], [], []>} : vector<8x8xf32>, vector<8x8xf32>, vector<8x8xf32> -> vector<8x8xf32>
    %68 = vector.extract_strided_slice %7 {offsets = [0, 24], sizes = [8, 8], strides = [1, 1]} : vector<8x32xf32> to vector<8x8xf32>
    %69 = vector.extract_strided_slice %8 {offsets = [0, 24], sizes = [8, 8], strides = [1, 1]} : vector<8x32xf32> to vector<8x8xf32>
    %70 = vector.extract_strided_slice %9 {offsets = [0, 24], sizes = [8, 8], strides = [1, 1]} : vector<8x32xf32> to vector<8x8xf32>
    %cst_30 = arith.constant dense<0.000000e+00> : vector<8x8xf32>
    %71 = tpu.matmul %68, %69, %cst_30 {dimension_numbers = #tpu.dot_dimension_numbers<[1], [1], [0], [0], [0, 0, 1, 0], [], []>} : vector<8x8xf32>, vector<8x8xf32>, vector<8x8xf32> -> vector<8x8xf32>
    %72 = arith.mulf %71, %10 : vector<8x8xf32>
    %cst_31 = arith.constant dense<0xFF800000> : vector<8xf32>
    %73 = vector.multi_reduction <maximumf>, %72, %cst_31 [1] : vector<8x8xf32> to vector<8xf32>
    %74 = vector.shape_cast %73 : vector<8xf32> to vector<8x1xf32>
    %75 = vector.broadcast %74 : vector<8x1xf32> to vector<8x8xf32>
    %76 = arith.subf %72, %75 : vector<8x8xf32>
    %77 = math.exp %76 : vector<8x8xf32>
    %cst_32 = arith.constant dense<0.000000e+00> : vector<8xf32>
    %78 = vector.multi_reduction <add>, %77, %cst_32 [1] : vector<8x8xf32> to vector<8xf32>
    %79 = vector.shape_cast %78 : vector<8xf32> to vector<8x1xf32>
    %80 = tpu.reciprocal %79 : vector<8x1xf32> -> vector<8x1xf32>
    %81 = vector.broadcast %80 : vector<8x1xf32> to vector<8x8xf32>
    %82 = arith.mulf %77, %81 : vector<8x8xf32>
    %c0_33 = arith.constant 0 : index
    %c3 = arith.constant 3 : index
    %c0_34 = arith.constant 0 : index
    %c0_35 = arith.constant 0 : index
    %83 = vector.load %arg8[%c0_33, %c3, %c0_34, %c0_35] : memref<1x4x8x8xf32, #tpu.memory_space<vmem>>, vector<1x1x8x8xf32>
    %84 = vector.shape_cast %83 : vector<1x1x8x8xf32> to vector<8x8xf32>
    %85 = vector.shape_cast %82 : vector<8x8xf32> to vector<1x1x8x8xf32>
    tpu.vector_store %arg8[%c0_33, %c3, %c0_34, %c0_35], %85 {strides = array<i32>} : memref<1x4x8x8xf32, #tpu.memory_space<vmem>>, vector<1x1x8x8xf32>,
    %cst_36 = arith.constant dense<0.000000e+00> : vector<8x8xf32>
    %86 = tpu.matmul %82, %70, %cst_36 {dimension_numbers = #tpu.dot_dimension_numbers<[1], [0], [0], [1], [0, 0, 1, 1], [], []>} : vector<8x8xf32>, vector<8x8xf32>, vector<8x8xf32> -> vector<8x8xf32>
    %87 = tpu.concatenate %29, %48, %67, %86 in 1 : vector<8x8xf32>, vector<8x8xf32>, vector<8x8xf32>, vector<8x8xf32> -> vector<8x32xf32>
    %c0_37 = arith.constant 0 : index
    %c0_38 = arith.constant 0 : index
    %88 = vector.load %arg4[%c0_37, %c0_38] : memref<32x32xf32, #tpu.memory_space<vmem>>, vector<32x32xf32>
    %cst_39 = arith.constant dense<0.000000e+00> : vector<8x32xf32>
    %89 = tpu.matmul %87, %88, %cst_39 {dimension_numbers = #tpu.dot_dimension_numbers<[1], [0], [0], [1], [0, 0, 1, 1], [], []>} : vector<8x32xf32>, vector<32x32xf32>, vector<8x32xf32> -> vector<8x32xf32>
    %c0_40 = arith.constant 0 : index
    %c0_41 = arith.constant 0 : index
    %90 = vector.load %arg5[%c0_40, %c0_41] : memref<1x32xf32, #tpu.memory_space<vmem>>, vector<1x32xf32>
    %91 = vector.broadcast %90 : vector<1x32xf32> to vector<8x32xf32>
    %92 = arith.addf %89, %91 : vector<8x32xf32>
    %c0_42 = arith.constant 0 : index
    %c0_43 = arith.constant 0 : index
    %c0_44 = arith.constant 0 : index
    %93 = vector.load %arg7[%c0_42, %c0_43, %c0_44] : memref<1x8x32xf32, #tpu.memory_space<vmem>>, vector<1x8x32xf32>
    %94 = vector.shape_cast %93 : vector<1x8x32xf32> to vector<8x32xf32>
    %95 = vector.shape_cast %92 : vector<8x32xf32> to vector<1x8x32xf32>
    tpu.vector_store %arg7[%c0_42, %c0_43, %c0_44], %95 {strides = array<i32>} : memref<1x8x32xf32, #tpu.memory_space<vmem>>, vector<1x8x32xf32>,
    return
  }
  func.func @transform_0(%arg0: i32) -> (i32, i32, i32) {
    %c0_i32 = arith.constant 0 : i32
    %c0_i32_0 = arith.constant 0 : i32
    %c0_i32_1 = arith.constant 0 : i32
    return %arg0, %c0_i32, %c0_i32_0 : i32, i32, i32
  }
  func.func @transform_1(%arg0: i32) -> (i32, i32) {
    %c0_i32 = arith.constant 0 : i32
    %c0_i32_0 = arith.constant 0 : i32
    %c0_i32_1 = arith.constant 0 : i32
    return %c0_i32, %c0_i32_0 : i32, i32
  }
  func.func @transform_2(%arg0: i32) -> (i32, i32) {
    %c0_i32 = arith.constant 0 : i32
    %c0_i32_0 = arith.constant 0 : i32
    %c0_i32_1 = arith.constant 0 : i32
    return %c0_i32, %c0_i32_0 : i32, i32
  }
  func.func @transform_3(%arg0: i32) -> (i32, i32) {
    %c0_i32 = arith.constant 0 : i32
    %c0_i32_0 = arith.constant 0 : i32
    %c0_i32_1 = arith.constant 0 : i32
    return %c0_i32, %c0_i32_0 : i32, i32
  }
  func.func @transform_4(%arg0: i32) -> (i32, i32) {
    %c0_i32 = arith.constant 0 : i32
    %c0_i32_0 = arith.constant 0 : i32
    %c0_i32_1 = arith.constant 0 : i32
    return %c0_i32, %c0_i32_0 : i32, i32
  }
  func.func @transform_5(%arg0: i32) -> (i32, i32) {
    %c0_i32 = arith.constant 0 : i32
    %c0_i32_0 = arith.constant 0 : i32
    %c0_i32_1 = arith.constant 0 : i32
    return %c0_i32, %c0_i32_0 : i32, i32
  }
  func.func @transform_6(%arg0: i32) -> (i32, i32, i32) {
    %c0_i32 = arith.constant 0 : i32
    %c0_i32_0 = arith.constant 0 : i32
    %c0_i32_1 = arith.constant 0 : i32
    return %arg0, %c0_i32, %c0_i32_0 : i32, i32, i32
  }
  func.func @transform_7(%arg0: i32) -> (i32, i32, i32, i32) {
    %c0_i32 = arith.constant 0 : i32
    %c0_i32_0 = arith.constant 0 : i32
    %c0_i32_1 = arith.constant 0 : i32
    %c0_i32_2 = arith.constant 0 : i32
    return %arg0, %c0_i32, %c0_i32_0, %c0_i32_1 : i32, i32, i32, i32
  }
}

</mosaic_0001>

<bundles_post_ra>
// kernel: tpu_custom_call.1
= control target key start
LH: loop header
LB: loop body
LE: loop exit
PB: predicated region body
PF: predicated region fallthrough
CT: control target
= control target key end

     0   :  { %s2214_s0 = inlined_call_operand.hbm [shape: f32[2,8,32], index: 0, kind: input, shape index: {}]   ;;  %s2215_s1 = inlined_call_operand.hbm [shape: f32[32,96], index: 1, kind: input, shape index: {}]   ;;  %s2216_s2 = inlined_call_operand.vmem [shape: f32[1,96], index: 2, kind: input, shape index: {}]   ;;  %s2217_s3 = inlined_call_operand.hbm [shape: f32[32,32], index: 3, kind: input, shape index: {}]   ;;  %s2218_s4 = inlined_call_operand.vmem [shape: f32[1,32], index: 4, kind: input, shape index: {}]   ;;  %s2219_s5 = inlined_call_operand.vmem [shape: f32[8,8], index: 5, kind: input, shape index: {}]   ;;  %s2220_s6 = inlined_call_operand.hbm [shape: f32[2,8,32], index: 6, kind: output, shape index: {0}]   ;;  %s2221_s7 = inlined_call_operand.hbm [shape: f32[2,4,8,8], index: 7, kind: output, shape index: {1}]  }
   0x1   :  { %2225 = sst [smem:[#allocation15_spill]] %s2214_s0 }
   0x2   :  { %13 = vsyncpa [#allocation3], 0 }
   0x3   :  { %15 = vsyncpa [#allocation3 + $0x1], 0 }
   0x4   :  { %16 = vsyncpa [#allocation6], 0 }
   0x5   :  { %17 = vsyncpa [#allocation4], 0 }
   0x6   :  { %19 = vsyncpa [#allocation4 + $0x1], 0 }
   0x7   :  { %20 = vsyncpa [#allocation10], 0 }
   0x8   :  { %22 = vsyncpa [#allocation10 + $0x1], 0  ;;  %s1853_s24 = smov 0   ;;  %s1855_s25 = smov 0  }
   0x9   :  { %s1857_s26 = smov 0   ;;  %s1859_s27 = smov 0  }
   0xa LB: > { %s1874_s28 = sadd.s32 4294967295, %s1786_s27   ;;  %s1350_s29 = sadd.s32 4294967294, %s1786_s27   ;;  %s1786_s27 = sphi %s1859_s27, %s2243_s27   ;;  %s1782_s26 = sphi %s1857_s26, %s2242_s26   ;;  %s1778_s25 = sphi %s1855_s25, %s2241_s25   ;;  %s1774_s24 = sphi %s1853_s24, %s2240_s24  }
   0xb   : > { %p48_p0 = scmp.ne.s32.totalorder %s1778_s25, %s1774_s24  ;;  %p2222_p1 = scmp.eq.s32.totalorder %s1874_s28, 0 }
   0xc   : > { %p183_p3 = scmp.eq.s32.totalorder %s1350_s29, 1  ;;  %p1351_p5 = scmp.ge.s32.totalorder %s1786_s27, 1 }
   0xd   : > { %p1883_p4 = por %p2222_p1, %p48_p0  ;;  %p216_p7 = scmp.lt.s32.totalorder %s1786_s27, 3 }
   0xe   : > { %p1888_p6 = por %p183_p3, %p48_p0  ;;  %s1788_s10 = smov [#allocation5]  }
   0xf   : > { %s2226_s30 = scalar_select %p1883_p4, 1, 0 }
  0x10   : > { %s2227_s8 = scalar_select %p1888_p6, 1, 0 }
  0x11   : > { %p1893_p8 = pnand %p1351_p5, %p216_p7  ;;  %s228_s11 = sshll.u32 %s1788_s10, 4  ;;  %s1897_s11 = int_to_ptr.vmem [resolvable:$true] %s228_s11 }
  0x12   : > { %s1789_s13 = smov [#allocation7]   ;;  %s1598_s17 = scalar_lea.hbm %s2215_s1, 512 }
  0x13   : > { %p1504_p9 = pneg %p1893_p8  ;;  %s244_s14 = sshll.u32 %s1789_s13, 4  ;;  %s1908_s14 = int_to_ptr.vmem [resolvable:$true] %s244_s14 }
  0x14   : > { %p1599_p12 = scmp.ne.s32.totalorder %s2215_s1, %s1598_s17  ;;  %p1605_p5 = scmp.lt.u32.totalorder %s1598_s17, %s2215_s1 }
  0x15   : > { %p1904_p11 = pnand %p1504_p9, %p2222_p1 }
  0x17   : > { %p1600_p13 = pneg %p1904_p11 }
  0x19   : > { %p1601_p0 = pnand %p1600_p13, %p1599_p12 }
  0x1b   : > { %p1602_p3 = pneg %p1601_p0 }
  0x1d   : > { %p1607_p7 = pnand %p1605_p5, %p1602_p3 }
  0x1f   : > { %1610 = shalt.err (!%p1607_p7)
}
  0x20   : > { %s1611_s22 = scalar_lea.vmem %s1897_s11, 512  ;;  %p1619_p2 = scmp.lt.s32.totalorder %s1897_s11, %s1897_s11 }
  0x21   : > { %p1612_p9 = scmp.ne.s32.totalorder %s1897_s11, %s1611_s22  ;;  %p1620_p12 = scmp.lt.s32.totalorder %s1611_s22, %s1611_s22 }
  0x23   : > { %p1614_p10 = pnand %p1612_p9, %p1600_p13  ;;  %p1621_p0 = por %p1620_p12, %p1619_p2 }
  0x25   : > { %p1615_p1 = pneg %p1614_p10 }
  0x27   : > { %p1622_p6 = pnand %p1621_p0, %p1615_p1 }
  0x29   : > { %1625 = shalt.err (!%p1622_p6)
}
  0x2a   : > { %s1790_s23 = smov 128   ;;  %s1791_s29 = smov 8  }
  0x2b   : > { %1507 = dma.hbm_to_vmem [thread:$0]  (!%p1904_p11), %s2215_s1, 512, %s1897_s11, [#allocation6], %s1790_s23, %s1790_s23, %s1791_s29  }
  0x2c   : > { %s1626_s17 = scalar_lea.hbm %s2217_s3, 512 }
  0x2d   : > { %p1627_p2 = scmp.ne.s32.totalorder %s2217_s3, %s1626_s17  ;;  %p1633_p10 = scmp.lt.u32.totalorder %s1626_s17, %s2217_s3 }
  0x2f   : > { %p1629_p1 = pnand %p1627_p2, %p1600_p13 }
  0x31   : > { %p1630_p6 = pneg %p1629_p1 }
  0x33   : > { %p1635_p3 = pnand %p1633_p10, %p1630_p6 }
  0x35   : > { %1638 = shalt.err (!%p1635_p3)
}
  0x36   : > { %s1639_s11 = scalar_lea.vmem %s1908_s14, 512  ;;  %p1647_p12 = scmp.lt.s32.totalorder %s1908_s14, %s1908_s14 }
  0x37   : > { %p1640_p5 = scmp.ne.s32.totalorder %s1908_s14, %s1639_s11  ;;  %p1648_p0 = scmp.lt.s32.totalorder %s1639_s11, %s1639_s11 }
  0x39   : > { %p1642_p7 = pnand %p1640_p5, %p1600_p13  ;;  %p1649_p2 = por %p1648_p0, %p1647_p12 }
  0x3b   : > { %p1643_p9 = pneg %p1642_p7 }
  0x3d   : > { %p1650_p1 = pnand %p1649_p2, %p1643_p9 }
  0x3f   : > { %1653 = shalt.err (!%p1650_p1)
}
  0x40   : > { %1510 = dma.hbm_to_vmem [thread:$0]  (!%p1904_p11), %s2217_s3, 512, %s1908_s14, [#allocation6], %s1790_s23, %s1790_s23, %s1791_s29  }
  0x41   : > { %s1963_s13 = sadd.s32 1, %s1786_s27   ;;  %s35_s12 = sadd.s32 1, %s1782_s26 }
  0x42   : > { %s32_s15 = ssub.s32 %s1786_s27, %s1963_s13  ;;  %p42_p13 = scmp.ne.s32.totalorder %s1782_s26, %s1778_s25 }
  0x43   : > { %p33_p6 = scmp.eq.s32.totalorder %s32_s15, 0  ;;  %p43_p10 = scmp.eq.s32.totalorder %s1786_s27, 0 }
  0x44   : > { %p2230_p3 = scmp.eq.s32.totalorder %s1874_s28, 1  ;;  %p1524_p7 = scmp.lt.s32.totalorder %s1786_s27, 2 }
  0x45   : > { %s1979_s17 = scalar_select %p33_p6, %s1782_s26, %s35_s12  }
  0x46   : > { %p1973_p5 = por %p2230_p3, %p42_p13  ;;  %p44_p9 = por %p43_p10, %p42_p13 }
  0x47   : > { %s264_s18 = sand.u32 1, %s1782_s26   ;;  %s1356_s14 = sshll.u32 %s1786_s27, 7 }
  0x48   : > { %s2231_s16 = scalar_select %p1973_p5, 1, 0 }
  0x49   : > { %s1355_s19 = sshll.u32 %s264_s18, 3  ;;  %s2232_s0 = sld [smem:[#allocation15_spill]] }
  0x4a   : > { %s268_s21 = scalar_lea.vmem [#allocation2], %s1355_s19  ;;  %p1990_p11 = pnand %p1524_p7, %p44_p9 }
  0x4b   : > { %s275_s11 = sshll.u32 %s268_s21, 4  ;;  %s265_s10 = scalar_lea.sflag [#allocation3], %s264_s18  ;;  %s1988_s11 = int_to_ptr.vmem [resolvable:$true] %s275_s11 }
  0x4c   : > { %p1656_p0 = pneg %p1990_p11 }
  0x4f   : > { %s1986_s20 = scalar_lea.hbm %s2232_s0, %s1356_s14  ;;  %s1659_s14 = scalar_lea.hbm %s2232_s0, 256 }
  0x50   : > { %s1654_s12 = scalar_lea.hbm %s1986_s20, 128  ;;  %p1660_p13 = scmp.lt.u32.totalorder %s1986_s20, %s2232_s0 }
  0x51   : > { %p1655_p12 = scmp.ne.s32.totalorder %s1986_s20, %s1654_s12  ;;  %p1661_p6 = scmp.lt.u32.totalorder %s1659_s14, %s1654_s12 }
  0x52   : > { %p1663_p3 = scmp.lt.u32.totalorder %s1654_s12, %s1986_s20 }
  0x53   : > { %p1657_p2 = pnand %p1656_p0, %p1655_p12  ;;  %p1662_p10 = por %p1661_p6, %p1660_p13 }
  0x55   : > { %p1658_p1 = pneg %p1657_p2  ;;  %p1664_p7 = por %p1663_p3, %p1662_p10 }
  0x57   : > { %p1665_p9 = pnand %p1664_p7, %p1658_p1 }
  0x59   : > { %1668 = shalt.err (!%p1665_p9)
}
  0x5a   : > { %s1669_s18 = scalar_lea.vmem %s1988_s11, 128  ;;  %s1792_s21 = smov [#allocation2]  }
  0x5b   : > { %p1670_p12 = scmp.ne.s32.totalorder %s1988_s11, %s1669_s18  ;;  %s1674_s15 = sshll.u32 %s1792_s21, 4  ;;  %s1675_s15 = int_to_ptr.vmem [resolvable:$false] %s1674_s15 }
  0x5c   : > { %s1676_s19 = scalar_lea.vmem %s1675_s15, 256  ;;  %p1677_p4 = scmp.lt.s32.totalorder %s1988_s11, %s1675_s15 }
  0x5d   : > { %p1672_p2 = pnand %p1670_p12, %p1656_p0  ;;  %p1678_p13 = scmp.lt.s32.totalorder %s1676_s19, %s1669_s18 }
  0x5f   : > { %p1673_p5 = pneg %p1672_p2  ;;  %p1679_p6 = por %p1678_p13, %p1677_p4 }
  0x61   : > { %p1680_p10 = pnand %p1679_p6, %p1673_p5 }
  0x63   : > { %1683 = shalt.err (!%p1680_p10)
}
  0x64   : > { %1514 = dma.hbm_to_vmem [thread:$0]  (!%p1990_p11), %s1986_s20, 128, %s1988_s11, %s265_s10  }
  0x65   : > { %284 = sbr.rel (%p1893_p8) target bundleno = 2118 (0x846), region = 44  ;;  %s2022_s12 = sand.u32 (!%p1893_p8), 1, %s1778_s25  }
  0x66   : > { %s1358_s14 = sshll.u32 (!%p1893_p8), %s2022_s12, 3  ;;  %s287_s23 = scalar_lea.sflag (!%p1893_p8), [#allocation3], %s2022_s12 }
  0x67   : > { %s290_s29 = scalar_lea.vmem (!%p1893_p8), [#allocation2], %s1358_s14  ;;  %p2234_p4 = scmp.ne.s32.totalorder (!%p1893_p8), %s2226_s30, 0 }
  0x6c   : > { %1757 = dma.done.wait (%p2234_p4), %s287_s23, 128  }
  0x6d   : > { %1759 = vsyncadd (%p2234_p4), %s287_s23, 4294967168  ;;  %p2235_p5 = scmp.eq.s32.totalorder %s1874_s28, 0 }
  0x6f   : > { %1761 = dma.done.wait (%p2235_p5), [#allocation6], 1024   ;;  %p2236_p8 = pmov %p2235_p5 }
  0x70   : > { %v1793_v0 = vmov 0.0|0.0   ;;  %vm1794_vm0 = vmmov 0   ;;  %v1795_v1 = vmov 0.0   ;;  %v335_v2 = vld [vmem:[#allocation5] sm:$0xff]  ;;  %v336_v3 = vld [vmem:[#allocation5 + $0x8] sm:$0xff]  ;;  %v337_v4 = vld [vmem:[#allocation5 + $0x10] sm:$0xff] }
  0x71   : > { %1763 = vsyncadd (%p2236_p8), [#allocation6], 4294966272  ;;  %1478 = vmatprep.subr.bf16.mxu0 %v1793_v0  ;;  %1424 = vmatprep.mubr.msk.f32.mxu0 %vm1794_vm0, %v1795_v1  ;;  %v1479_v5 = vpack.c.bf16 %v336_v3, %v335_v2  ;;  %v338_v6 = vld [vmem:[#allocation5 + $0x18] sm:$0xff]  ;;  %vm346_vm1 = vcmask 261120   ;;  %v1363_v9 = vld [vmem:[%s2216_s2] ss:$0 sm:$0xff] }
  0x72   : > { %1427 = vmatprep.subr.mxu1 %v1795_v1  ;;  %1429 = vmatprep.mubr.msk.f32.mxu1 %vm1794_vm0, %v1795_v1  ;;  %v1482_v7 = vpack.c.bf16 %v338_v6, %v337_v4  ;;  %v334_v8 = vld [vmem:[%s290_s29] sm:$0xff]  ;;  %s1796_s20 = smov 64   ;;  %s1797_s11 = smov 96   ;;  %vm424_vm2 = vcmask 64512   ;;  %vm1105_vm3 = vcmask 130048   ;;  %vm1107_vm4 = vcmask 195584  }
  0x73   : > { %1480 = vmatpush3.bf16.msra.mxu0 %v1479_v5  ;;  %s1798_s22 = smov 88   ;;  %s1799_s10 = smov 120   ;;  %v420_v18 = vld [vmem:[%s2219_s5] sm:$0xff] }
  0x74   : > { %1481 = vmatprep.subr.bf16.mxu0 %v1793_v0  ;;  %s1800_s18 = smov 80   ;;  %s1801_s19 = smov 72  }
  0x75   : > { %s1802_s23 = smov 112   ;;  %s1803_s29 = smov 104  }
  0x76   : > { %s1362_s30 = sshll.u32 %s2022_s12, 5  ;;  %s1809_s21 = smov 24  }
  0x77   : > { %1483 = vmatpush3.bf16.msra.mxu0 %v1482_v7  ;;  %s2083_s9 = scalar_lea.vmem [#allocation9], %s1362_s30  ;;  %s1389_s15 = sshll.u32 %s1874_s28, 9 }
  0x78   : > { %1447 = vmatprep.subr.mxu0 %v1795_v1  ;;  %s2131_s30 = scalar_lea.hbm %s2221_s7, %s1389_s15  ;;  %p2237_p0 = scmp.ne.s32.totalorder %s2231_s16, 0 }
  0x7a   : > { %1425 = vmatmul.mubr.msk.f32.vlgmr.msra.gmra.mrb[0].mxu0 %vm346_vm1, %v334_v8 }
  0x7b   : > { %1449 = vmatprep.mubr.msk.f32.mxu0 %vm1794_vm0, %v1795_v1 }
 0x14d   : > { %v416_v10 = vpop.f32.mrb[0].mxu0 }
 0x14e   : > { %v2050_v11 = vadd.f32 %v1363_v9, %v416_v10  ;;  %v1426_v12 = vpop.f32.mrb[1].mxu0 }
 0x150   : > { %512 = vrot.lane.b32.xlu1 %v2050_v11, %s1796_s20  ;;  %422 = vrot.lane.b32.xlu0 %v2050_v11, %s1797_s11  ;;  %s1804_s20 = smov 56   ;;  %s1805_s11 = smov 48  }
 0x154   : > { %590 = vrot.lane.b32.xlu1 %v2050_v11, %s1798_s22  ;;  %s1806_s22 = smov 40  }
 0x158   : > { %588 = vrot.lane.b32.xlu1 %v2050_v11, %s1799_s10  ;;  %s1807_s10 = smov 8  }
 0x15c   : > { %758 = vrot.lane.b32.xlu1 %v2050_v11, %s1800_s18  ;;  %s1808_s18 = smov 16  }
 0x1c2   : > { %v513_v13 = vpop.permute.xlu1 %512  ;;  %v423_v14 = vpop.permute.xlu0 %422 }
 0x1c3   : > { %1428 = vmatpush3.xpose.msk.msra.mxu1 %vm424_vm2, %v423_v14  ;;  %v1110_v14 = vld [vmem:[#allocation7 + $0x8] sm:$0xff] }
 0x1c4   : > { %1432 = vmatprep.subr.mxu1 %v1795_v1 }
 0x1c6   : > { %v591_v15 = vpop.permute.xlu1 %590  ;;  %1430 = vmatmul.mubr.msk.f32.vlgmr.msra.gmra.mrb[0].mxu1 %vm424_vm2, %v2050_v11 }
 0x1c7   : > { %1433 = vmatpush3.msra.mxu1 %v513_v13  ;;  %1434 = vmatprep.mubr.msk.f32.mxu1 %vm1794_vm0, %v1795_v1  ;;  %v1109_v13 = vld [vmem:[#allocation7] sm:$0xff] }
 0x1c8   : > { %1437 = vmatprep.subr.mxu1 %v1795_v1 }
 0x1ca   : > { %v589_v16 = vpop.permute.xlu1 %588 }
 0x1ce   : > { %v759_v17 = vpop.permute.xlu1 %758 }
 0x1cf   : > { %1448 = vmatpush3.xpose.msk.msra.mxu0 %vm424_vm2, %v759_v17  ;;  %v1112_v17 = vld [vmem:[#allocation7 + $0x18] sm:$0xff] }
 0x1d0   : > { %1457 = vmatprep.subr.mxu0 %v1795_v1 }
 0x299   : > { %v495_v19 = vpop.f32.mrb[0].mxu1 }
 0x29a   : > { %v499_v20 = vmul.f32 %v495_v19, %v420_v18  ;;  %v1431_v21 = vpop.f32.mrb[1].mxu1 }
 0x29c   : > { %v500_v22 = vsel %vm424_vm2, %v499_v20, -inf }
 0x29d   : > { %501 = vmax.xlane.f32.xlu0 %v500_v22 }
 0x2b3   : > { %926 = vrot.lane.b32.xlu0 %v2050_v11, %s1801_s19  ;;  %s1226_s19 = sshll.u32 %s2083_s9, 4  ;;  %s2133_s19 = int_to_ptr.vmem [resolvable:$true] %s1226_s19 }
 0x32a   : > { %v502_v23 = vpop.xlane.xlu0 %501 }
 0x32b   : > { %v503_v24 = vsub.f32 %v499_v20, %v502_v23 }
 0x32d   : > { %v504_v25 = vmul.f32 1.442695, %v503_v24 }
 0x32e   : > { %v927_v30 = vpop.permute.xlu0 %926 }
 0x32f   : > { %1582 = vpow2.f32 %v504_v25 }
 0x339   : > { %v1583_v26 = vpop.eup %1582 }
 0x33a   : > { %v506_v27 = vsel %vm424_vm2, %v1583_v26, 0.0 }
 0x33b   : > { %507 = vadd.xlane.f32.xlu1 %v506_v27 }
 0x34c   : > { %756 = vrot.lane.b32.xlu1 %v2050_v11, %s1802_s23 }
 0x350   : > { %924 = vrot.lane.b32.xlu1 %v2050_v11, %s1803_s29 }
 0x3c8   : > { %v508_v28 = vpop.xlane.xlu1 %507 }
 0x3c9   : > { %1584 = vrcp.f32 %v508_v28 }
 0x3cc   : > { %v757_v29 = vpop.permute.xlu1 %756 }
 0x3cd   : > { %1450 = vmatmul.mubr.msk.f32.vlgmr.msra.gmra.mrb[2].mxu0 %vm424_vm2, %v757_v29 }
 0x3ce   : > { %1458 = vmatpush3.xpose.msk.msra.mxu0 %vm424_vm2, %v927_v30  ;;  %1459 = vmatprep.mubr.msk.f32.mxu0 %vm1794_vm0, %v1795_v1 }
 0x3cf   : > { %1484 = vmatprep.subr.bf16.mxu0 %v1793_v0 }
 0x3d0   : > { %v925_v31 = vpop.permute.xlu1 %924 }
 0x3d1   : > { %1460 = vmatmul.mubr.msk.f32.vlgmr.msra.gmra.mrb[4].mxu0 %vm424_vm2, %v925_v31 }
 0x3d2   : > { %1475 = vmatprep.mubr.msk.f32.mxu0 %vm1794_vm0, %v1795_v1 }
 0x3d3   : > { %v1585_v32 = vpop.eup %1584 }
 0x3d4   : > { %v510_v33 = vmul.f32 %v1585_v32, %v1583_v26 }
 0x3d6   : > { %511 = vst.msk [vmem:[%s2083_s9] sm:$0xff] %vm424_vm2, %v510_v33  ;;  %1435 = vmatmul.mubr.msk.f32.vlgmr.msra.gmra.mrb[2].mxu1 %vm424_vm2, %v510_v33 }
 0x3d7   : > { %1438 = vmatpush3.xpose.msk.msra.mxu1 %vm424_vm2, %v591_v15  ;;  %1439 = vmatprep.mubr.msk.f32.mxu1 %vm1794_vm0, %v1795_v1  ;;  %v1485_v15 = vpack.c.bf16 %v1110_v14, %v1109_v13 }
 0x3d8   : > { %1442 = vmatprep.subr.mxu1 %v1795_v1 }
 0x3d9   : > { %1486 = vmatpush3.bf16.msra.mxu0 %v1485_v15 }
 0x3da   : > { %1440 = vmatmul.mubr.msk.f32.vlgmr.msra.gmra.mrb[4].mxu1 %vm424_vm2, %v589_v16  ;;  %1487 = vmatprep.subr.bf16.mxu0 %v1793_v0  ;;  %v1111_v16 = vld [vmem:[#allocation7 + $0x10] sm:$0xff] }
 0x3db   : > { %1444 = vmatprep.mubr.msk.f32.mxu1 %vm1794_vm0, %v1795_v1 }
 0x4a0   : > { %v830_v34 = vpop.f32.mrb[2].mxu0 }
 0x4a1   : > { %v834_v35 = vmul.f32 %v830_v34, %v420_v18  ;;  %v1451_v36 = vpop.f32.mrb[3].mxu0 }
 0x4a3   : > { %v835_v37 = vsel %vm424_vm2, %v834_v35, -inf }
 0x4a4   : > { %836 = vmax.xlane.f32.xlu0 %v835_v37  ;;  %v998_v38 = vpop.f32.mrb[4].mxu0 }
 0x4a5   : > { %v1461_v39 = vpop.f32.mrb[5].mxu0  ;;  %v1002_v45 = vmul.f32 %v998_v38, %v420_v18 }
 0x4a7   : > { %v1003_v47 = vsel %vm424_vm2, %v1002_v45, -inf }
 0x4a9   : > { %v2096_v40 = vpop.f32.mrb[2].mxu1 }
 0x4aa   : > { %v1436_v41 = vpop.f32.mrb[3].mxu1 }
 0x4ad   : > { %v662_v42 = vpop.f32.mrb[4].mxu1 }
 0x4ae   : > { %v666_v43 = vmul.f32 %v662_v42, %v420_v18  ;;  %v1441_v44 = vpop.f32.mrb[5].mxu1  ;;  %v1488_v18 = vpack.c.bf16 %v1112_v17, %v1111_v16 }
 0x4b0   : > { %v667_v46 = vsel %vm424_vm2, %v666_v43, -inf  ;;  %1489 = vmatpush3.bf16.msra.mxu0 %v1488_v18 }
 0x4b1   : > { %668 = vmax.xlane.f32.xlu1 %v667_v46 }
 0x4b5   : > { %1004 = vmax.xlane.f32.xlu1 %v1003_v47 }
 0x531   : > { %v837_v48 = vpop.xlane.xlu0 %836 }
 0x532   : > { %v838_v49 = vsub.f32 %v834_v35, %v837_v48 }
 0x534   : > { %v839_v50 = vmul.f32 1.442695, %v838_v49 }
 0x536   : > { %1586 = vpow2.f32 %v839_v50 }
 0x53e   : > { %v669_v51 = vpop.xlane.xlu1 %668 }
 0x53f   : > { %v670_v59 = vsub.f32 %v666_v43, %v669_v51 }
 0x540   : > { %v1587_v52 = vpop.eup %1586 }
 0x541   : > { %v841_v53 = vsel %vm424_vm2, %v1587_v52, 0.0  ;;  %v671_v60 = vmul.f32 1.442695, %v670_v59 }
 0x542   : > { %842 = vadd.xlane.f32.xlu1 %v841_v53  ;;  %v1005_v54 = vpop.xlane.xlu1 %1004 }
 0x543   : > { %v1006_v55 = vsub.f32 %v1002_v45, %v1005_v54 }
 0x545   : > { %v1007_v56 = vmul.f32 1.442695, %v1006_v55 }
 0x547   : > { %1588 = vpow2.f32 %v1007_v56 }
 0x548   : > { %1590 = vpow2.f32 %v671_v60 }
 0x551   : > { %v1589_v57 = vpop.eup %1588 }
 0x552   : > { %v1009_v58 = vsel %vm424_vm2, %v1589_v57, 0.0  ;;  %v1591_v61 = vpop.eup %1590 }
 0x553   : > { %680 = vrot.lane.b32.xlu1 %v2050_v11, %s1804_s20  ;;  %1010 = vadd.xlane.f32.xlu0 %v1009_v58  ;;  %v673_v62 = vsel %vm424_vm2, %v1591_v61, 0.0  ;;  %s1200_s20 = scalar_lea.sflag [#allocation10], %s2022_s12 }
 0x569   : > { %848 = vrot.lane.b32.xlu0 %v2050_v11, %s1805_s11  ;;  %s1684_s11 = scalar_lea.vmem %s2133_s19, 512 }
 0x56a   : > { %p1685_p11 = scmp.ne.s32.totalorder %s2133_s19, %s1684_s11 }
 0x56c   : > { %p1686_p1 = pnand %p1685_p11, %p2237_p0 }
 0x56e   : > { %p1687_p3 = pneg %p1686_p1 }
 0x577   : > { %674 = vadd.xlane.f32.xlu1 %v673_v62 }
 0x588   : > { %1016 = vrot.lane.b32.xlu1 %v2050_v11, %s1806_s22  ;;  %s1810_s22 = smov [#allocation9]  }
 0x5cf   : > { %v843_v63 = vpop.xlane.xlu1 %842 }
 0x5d0   : > { %1592 = vrcp.f32 %v843_v63 }
 0x5d3   : > { %v681_v2 = vpop.permute.xlu1 %680 }
 0x5d4   : > { %1443 = vmatpush3.msra.mxu1 %v681_v2 }
 0x5d5   : > { %1452 = vmatprep.subr.mxu1 %v1795_v1 }
 0x5da   : > { %v1593_v3 = vpop.eup %1592 }
 0x5db   : > { %v845_v4 = vmul.f32 %v1593_v3, %v1587_v52 }
 0x5dd   : > { %1374 = vst.msk [vmem:[%s2083_s9 + $0x10] sm:$0xff] %vm424_vm2, %v845_v4 }
 0x5e0   : > { %v1011_v5 = vpop.xlane.xlu0 %1010 }
 0x5e1   : > { %1594 = vrcp.f32 %v1011_v5 }
 0x5e4   : > { %v849_v11 = vpop.permute.xlu0 %848 }
 0x5eb   : > { %v1595_v6 = vpop.eup %1594 }
 0x5ec   : > { %v1013_v7 = vmul.f32 %v1595_v6, %v1589_v57 }
 0x5ee   : > { %1378 = vst.msk [vmem:[%s2083_s9 + $0x18] sm:$0xff] %vm424_vm2, %v1013_v7 }
 0x604   : > { %v675_v8 = vpop.xlane.xlu1 %674 }
 0x605   : > { %1596 = vrcp.f32 %v675_v8 }
 0x608   : > { %v1017_v12 = vpop.permute.xlu1 %1016 }
 0x60f   : > { %v1597_v9 = vpop.eup %1596 }
 0x610   : > { %v677_v10 = vmul.f32 %v1597_v9, %v1591_v61 }
 0x612   : > { %1370 = vst.msk [vmem:[%s2083_s9 + $0x8] sm:$0xff] %vm424_vm2, %v677_v10  ;;  %1445 = vmatmul.mubr.msk.f32.vlgmr.msra.gmra.mrb[6].mxu1 %vm424_vm2, %v677_v10 }
 0x613   : > { %1453 = vmatpush3.msra.mxu1 %v849_v11  ;;  %1454 = vmatprep.mubr.msk.f32.mxu1 %vm1794_vm0, %v1795_v1 }
 0x614   : > { %1462 = vmatprep.subr.mxu1 %v1795_v1 }
 0x616   : > { %1455 = vmatmul.mubr.msk.f32.vlgmr.msra.gmra.mrb[8].mxu1 %vm424_vm2, %v845_v4 }
 0x617   : > { %1463 = vmatpush3.msra.mxu1 %v1017_v12  ;;  %1464 = vmatprep.mubr.msk.f32.mxu1 %vm1794_vm0, %v1795_v1 }
 0x61a   : > { %1465 = vmatmul.mubr.msk.f32.vlgmr.msra.gmra.mrb[10].mxu1 %vm424_vm2, %v1013_v7 }
 0x6e5   : > { %v752_v19 = vpop.f32.mrb[6].mxu1 }
 0x6e6   : > { %1093 = vrot.lane.b32.xlu1 %v752_v19, %s1807_s10  ;;  %v1446_v20 = vpop.f32.mrb[7].mxu1 }
 0x6e9   : > { %v920_v21 = vpop.f32.mrb[8].mxu1 }
 0x6ea   : > { %1097 = vrot.lane.b32.xlu0 %v920_v21, %s1808_s18  ;;  %v1456_v1 = vpop.f32.mrb[9].mxu1  ;;  %s1688_s18 = sshll.u32 %s1810_s22, 4  ;;  %s1689_s18 = int_to_ptr.vmem [resolvable:$false] %s1688_s18 }
 0x6eb   : > { %s1690_s9 = scalar_lea.vmem %s1689_s18, 1024  ;;  %p1691_p7 = scmp.lt.s32.totalorder %s2133_s19, %s1689_s18 }
 0x6ec   : > { %p1692_p9 = scmp.lt.s32.totalorder %s1690_s9, %s1684_s11 }
 0x6ed   : > { %v1088_v22 = vpop.f32.mrb[10].mxu1 }
 0x6ee   : > { %1101 = vrot.lane.b32.xlu1 %v1088_v22, %s1809_s21  ;;  %v1466_v0 = vpop.f32.mrb[11].mxu1  ;;  %p1693_p12 = por %p1692_p9, %p1691_p7 }
 0x6f0   : > { %p1694_p2 = pnand %p1693_p12, %p1687_p3 }
 0x758   : > { %v1094_v23 = vpop.permute.xlu1 %1093 }
 0x759   : > { %v1104_v25 = vsel %vm424_vm2, %v2096_v40, %v1094_v23 }
 0x75c   : > { %v1098_v24 = vpop.permute.xlu0 %1097 }
 0x75d   : > { %v1106_v26 = vsel %vm1105_vm3, %v1104_v25, %v1098_v24 }
 0x760   : > { %v1102_v27 = vpop.permute.xlu1 %1101 }
 0x761   : > { %v1108_v28 = vsel %vm1107_vm4, %v1106_v26, %v1102_v27 }
 0x762   : > { %1476 = vmatmul.mubr.msk.f32.vlgmr.msra.gmra.mrb[6].mxu0 %vm346_vm1, %v1108_v28 }
 0x763   : > { %1697 = shalt.err (!%p1694_p2)
}
 0x764   : > { %s1698_s21 = scalar_lea.hbm %s2131_s30, 512  ;;  %s1702_s29 = scalar_lea.hbm %s2221_s7, 1024 }
 0x765   : > { %p1699_p13 = scmp.ne.s32.totalorder %s2131_s30, %s1698_s21  ;;  %p1703_p4 = scmp.lt.u32.totalorder %s2131_s30, %s2221_s7 }
 0x766   : > { %p1704_p5 = scmp.lt.u32.totalorder %s1702_s29, %s1698_s21  ;;  %p1706_p11 = scmp.lt.u32.totalorder %s1698_s21, %s2131_s30 }
 0x767   : > { %p1700_p6 = pnand %p1699_p13, %p2237_p0 }
 0x768   : > { %p1705_p8 = por %p1704_p5, %p1703_p4 }
 0x769   : > { %p1701_p10 = pneg %p1700_p6 }
 0x76a   : > { %p1707_p1 = por %p1706_p11, %p1705_p8 }
 0x76c   : > { %p1708_p3 = pnand %p1707_p1, %p1701_p10 }
 0x76e   : > { %1711 = shalt.err (!%p1708_p3)
}
 0x76f   : > { %s1811_s11 = smov 128   ;;  %v1380_v29 = vld [vmem:[%s2218_s4] ss:$0 sm:$0xff]  ;;  %s1384_s21 = sshll.u32 %s1874_s28, 7 }
 0x770   : > { %1501 = dma.vmem_to_hbm [thread:$0]  (%p2237_p0), %s2133_s19, 512, %s2131_s30, %s1200_s20, %s1811_s11, %s1811_s11, %s1807_s10  }
 0x771   : > { %s326_s23 = scalar_lea.vmem [#allocation8], %s1358_s14  ;;  %s2169_s0 = scalar_lea.hbm %s2220_s6, %s1384_s21 }
 0x772   : > { %s1213_s29 = sshll.u32 %s326_s23, 4  ;;  %s1195_s10 = scalar_lea.sflag [#allocation4], %s2022_s12  ;;  %s2171_s29 = int_to_ptr.vmem [resolvable:$true] %s1213_s29 }
 0x773   : > { %s1712_s28 = scalar_lea.vmem %s2171_s29, 128  ;;  %s1812_s14 = smov [#allocation8]  }
 0x774   : > { %p1713_p7 = scmp.ne.s32.totalorder %s2171_s29, %s1712_s28  ;;  %s1716_s19 = sshll.u32 %s1812_s14, 4  ;;  %s1717_s19 = int_to_ptr.vmem [resolvable:$false] %s1716_s19 }
 0x775   : > { %s1718_s30 = scalar_lea.vmem %s1717_s19, 256  ;;  %p1719_p2 = scmp.lt.s32.totalorder %s2171_s29, %s1717_s19 }
 0x776   : > { %p1714_p9 = pnand %p1713_p7, %p2237_p0  ;;  %p1720_p13 = scmp.lt.s32.totalorder %s1718_s30, %s1712_s28 }
 0x778   : > { %p1715_p12 = pneg %p1714_p9  ;;  %p1721_p6 = por %p1720_p13, %p1719_p2 }
 0x77a   : > { %p1722_p10 = pnand %p1721_p6, %p1715_p12 }
 0x835   : > { %v1189_v30 = vpop.f32.mrb[6].mxu0 }
 0x836   : > { %v1190_v31 = vadd.f32 %v1380_v29, %v1189_v30  ;;  %v1477_v32 = vpop.f32.mrb[7].mxu0 }
 0x838   : > { %1193 = vst.msk [vmem:[%s326_s23] sm:$0xff] %vm346_vm1, %v1190_v31 }
 0x839   : > { %1725 = shalt.err (!%p1722_p10)
}
 0x83a   : > { %s1726_s12 = scalar_lea.hbm %s2169_s0, 128  ;;  %s1730_s9 = scalar_lea.hbm %s2220_s6, 256 }
 0x83b   : > { %p1727_p4 = scmp.ne.s32.totalorder %s2169_s0, %s1726_s12  ;;  %p1731_p11 = scmp.lt.u32.totalorder %s2169_s0, %s2220_s6 }
 0x83c   : > { %p1732_p1 = scmp.lt.u32.totalorder %s1730_s9, %s1726_s12  ;;  %p1734_p7 = scmp.lt.u32.totalorder %s1726_s12, %s2169_s0 }
 0x83d   : > { %p1728_p5 = pnand %p1727_p4, %p2237_p0 }
 0x83e   : > { %p1733_p3 = por %p1732_p1, %p1731_p11 }
 0x83f   : > { %p1729_p8 = pneg %p1728_p5 }
 0x840   : > { %p1735_p9 = por %p1734_p7, %p1733_p3 }
 0x842   : > { %p1736_p12 = pnand %p1735_p9, %p1729_p8 }
 0x844   : > { %1739 = shalt.err (!%p1736_p12)
}
 0x845   : > { %1500 = dma.vmem_to_hbm [thread:$0]  (%p2237_p0), %s2171_s29, 128, %s2169_s0, %s1195_s10  }
 0x846 PF: > { %s1241_s23 = sand.u32 1, %s1774_s24   ;;  %p2238_p2 = scmp.ne.s32.totalorder %s2227_s8, 0 }
 0x847   : > { %p2239_p13 = scmp.ge.s32.totalorder %s1786_s27, 2  ;;  %s1242_s22 = scalar_lea.sflag [#allocation4], %s1241_s23 }
 0x849   : > { %p1516_p6 = pnand %p2239_p13, %p2238_p2 }
 0x84b   : > { %1765 = dma.done.wait (!%p1516_p6), %s1242_s22, 128  }
 0x84c   : > { %1767 = vsyncadd (!%p1516_p6), %s1242_s22, 4294967168  ;;  %s1251_s18 = scalar_lea.sflag [#allocation10], %s1241_s23 }
 0x84d   : > { %1769 = dma.done.wait (!%p1516_p6), %s1251_s18, 512  }
 0x84e   : > { %1771 = vsyncadd (!%p1516_p6), %s1251_s18, 4294966784  ;;  %p25_p0 = scmp.ge.s32.totalorder %s1963_s13, 4   ;;  %s2240_s24 = smov %s1778_s25 }
 0x84f   : > { %s2241_s25 = smov %s1782_s26  ;;  %s2242_s26 = smov %s1979_s17 }
 0x850   : > { %s2243_s27 = smov %s1963_s13  ;;  %27 = sbr.rel (!%p25_p0) target bundleno = 10 (0xa), region = 117 }
 0x857   :  { %1256 = vsyncpa [#allocation3], 1 }
 0x858   :  { %1258 = vsyncpa [#allocation3 + $0x1], 1 }
 0x859   :  { %1259 = vsyncpa [#allocation6], 1 }
 0x85a   :  { %1260 = vsyncpa [#allocation4], 1 }
 0x85b   :  { %1262 = vsyncpa [#allocation4 + $0x1], 1 }
 0x85c   :  { %1263 = vsyncpa [#allocation10], 1 }
 0x85d   :  { %1265 = vsyncpa [#allocation10 + $0x1], 1 }

</bundles_post_ra>
